<compile_context>
chip_gen: v5e
topology: v5e:2x2
jax: 0.10.0
libtpu: 0.0.40
codegen_flags: <defaults>
</compile_context>

<pallas_src>
import jax
import jax.numpy as jnp
from jax.experimental import pallas as pl
from jax.experimental.pallas import tpu as pltpu


def _pos_enc_kernel(x_ref, pos_ref, o_ref):
    # x_ref:   (B, tile_t, D)   in native dtype
    # pos_ref: (1, tile_t, D)   learnable positional embedding slice
    # o_ref:   (B, tile_t, D)
    # Broadcast-add over the batch dim; cast once to the output dtype.
    o_ref[...] = (x_ref[...] + pos_ref[...]).astype(o_ref.dtype)


def _pick_tile_t(T, B, D, itemsize, *, vmem_budget_bytes=8 * 1024 * 1024):
    """Largest sequence tile that (a) divides T, (b) is a multiple of 8 (sublane
    friendly) and (c) keeps the double-buffered x/pos/out blocks inside a
    conservative VMEM budget (safe on v7x's smaller 64 MiB VMEM). Falls back to
    the full T (always a legal block shape)."""
    # bytes per row of a block ~ (B + 1 + B) * D * itemsize  (x + pos + out), x2 for double buffering
    bytes_per_row = 2 * (2 * B + 1) * D * itemsize
    max_rows = max(8, vmem_budget_bytes // max(bytes_per_row, 1))
    if T <= max_rows:
        return T
    if T % 8 == 0:
        cand = (max_rows // 8) * 8
        while cand >= 8:
            if T % cand == 0:
                return cand
            cand -= 8
    return T


def learnable_positional_encoding(x, pos_embedding):
    """x: (B, T, D); pos_embedding: (1, max_len, D) with max_len >= T."""
    B, T, D = x.shape
    assert pos_embedding.shape[0] == 1 and pos_embedding.shape[2] == D
    assert pos_embedding.shape[1] >= T

    # Glue: static slice of the learnable table to the current sequence length.
    pos = pos_embedding[:, :T, :]

    out_dtype = jnp.promote_types(x.dtype, pos.dtype)
    tile_t = _pick_tile_t(T, B, D, jnp.dtype(out_dtype).itemsize)
    grid = (T // tile_t,)

    return pl.pallas_call(
        _pos_enc_kernel,
        out_shape=jax.ShapeDtypeStruct((B, T, D), out_dtype),
        grid_spec=pltpu.PrefetchScalarGridSpec(
            num_scalar_prefetch=0,
            grid=grid,
            in_specs=[
                pl.BlockSpec((B, tile_t, D), lambda j: (0, j, 0)),
                pl.BlockSpec((1, tile_t, D), lambda j: (0, j, 0)),
            ],
            out_specs=pl.BlockSpec((B, tile_t, D), lambda j: (0, j, 0)),
        ),
        compiler_params=pltpu.CompilerParams(
            dimension_semantics=("parallel",),
        ),
    )(x, pos)


if __name__ == "__main__":
    key = jax.random.PRNGKey(0)
    k_x, k_pos = jax.random.split(key)

    # Small shapes consistent with the module: batch=2, seq=8, d_model=32, max_len=40.
    B, T, D, MAX_LEN = 2, 8, 32, 40

    x = jax.random.normal(k_x, (B, T, D), dtype=jnp.float32)
    pos_embedding = jax.random.normal(k_pos, (1, MAX_LEN, D), dtype=jnp.float32)

    out = learnable_positional_encoding(x, pos_embedding)
    jax.block_until_ready(out)

    # Reference check in plain JAX (forward semantics of the PyTorch module).
    ref = x + pos_embedding[:, :T, :]
    assert out.shape == (B, T, D), out.shape
    assert jnp.allclose(out, ref, rtol=1e-6, atol=1e-6), (
        float(jnp.max(jnp.abs(out - ref)))
    )

    print("KERNEL_OK")
</pallas_src>

<mosaic_0001>
module attributes {stable_mosaic.version = 11 : i64} {
  func.func @_pos_enc_kernel(%arg0: i32, %arg1: memref<2x8x32xf32, #tpu.memory_space<vmem>>, %arg2: memref<1x8x32xf32, #tpu.memory_space<vmem>>, %arg3: memref<2x8x32xf32, #tpu.memory_space<vmem>>) attributes {dimension_semantics = [#tpu.dimension_semantics<parallel>], iteration_bounds = array<i64: 1>, scalar_prefetch = 0 : i64, scratch_operands = 0 : i64, tpu.core_type = #tpu.core_type<tc>, window_params = [{transform_indices = @transform_0, window_bounds = array<i64: 2, 8, 32>}, {transform_indices = @transform_1, window_bounds = array<i64: 1, 8, 32>}, {transform_indices = @transform_2, window_bounds = array<i64: 2, 8, 32>}]} {
    %c0 = arith.constant 0 : index
    %c0_0 = arith.constant 0 : index
    %c0_1 = arith.constant 0 : index
    %0 = vector.load %arg1[%c0, %c0_0, %c0_1] : memref<2x8x32xf32, #tpu.memory_space<vmem>>, vector<2x8x32xf32>
    %c0_2 = arith.constant 0 : index
    %c0_3 = arith.constant 0 : index
    %c0_4 = arith.constant 0 : index
    %1 = vector.load %arg2[%c0_2, %c0_3, %c0_4] : memref<1x8x32xf32, #tpu.memory_space<vmem>>, vector<1x8x32xf32>
    %2 = vector.broadcast %1 : vector<1x8x32xf32> to vector<2x8x32xf32>
    %3 = arith.addf %0, %2 : vector<2x8x32xf32>
    %c0_5 = arith.constant 0 : index
    %c0_6 = arith.constant 0 : index
    %c0_7 = arith.constant 0 : index
    %4 = vector.load %arg3[%c0_5, %c0_6, %c0_7] : memref<2x8x32xf32, #tpu.memory_space<vmem>>, vector<2x8x32xf32>
    tpu.vector_store %arg3[%c0_5, %c0_6, %c0_7], %3 {strides = array<i32>} : memref<2x8x32xf32, #tpu.memory_space<vmem>>, vector<2x8x32xf32>,
    return
  }
  func.func @transform_0(%arg0: i32) -> (i32, i32, i32) {
    %c0_i32 = arith.constant 0 : i32
    %c0_i32_0 = arith.constant 0 : i32
    %c0_i32_1 = arith.constant 0 : i32
    return %c0_i32, %arg0, %c0_i32_0 : i32, i32, i32
  }
  func.func @transform_1(%arg0: i32) -> (i32, i32, i32) {
    %c0_i32 = arith.constant 0 : i32
    %c0_i32_0 = arith.constant 0 : i32
    %c0_i32_1 = arith.constant 0 : i32
    return %c0_i32, %arg0, %c0_i32_0 : i32, i32, i32
  }
  func.func @transform_2(%arg0: i32) -> (i32, i32, i32) {
    %c0_i32 = arith.constant 0 : i32
    %c0_i32_0 = arith.constant 0 : i32
    %c0_i32_1 = arith.constant 0 : i32
    return %c0_i32, %arg0, %c0_i32_0 : i32, i32, i32
  }
}

</mosaic_0001>

<bundles_post_ra>
// kernel: tpu_custom_call.1
= control target key start
LH: loop header
LB: loop body
LE: loop exit
PB: predicated region body
PF: predicated region fallthrough
CT: control target
= control target key end

     0   :  { %7 = vsyncpa [#allocation3], 0  ;;  %s182_s0 = inlined_call_operand.hbm [shape: f32[2,8,32], index: 0, kind: input, shape index: {}]   ;;  %s183_s1 = inlined_call_operand.hbm [shape: f32[1,8,32], index: 1, kind: input, shape index: {}]   ;;  %s184_s2 = inlined_call_operand.hbm [shape: f32[2,8,32], index: 2, kind: output, shape index: {}]  }
   0x1   :  { %8 = vsyncpa [#allocation6], 0 }
   0x2   :  { %9 = vsyncpa [#allocation4], 0  ;;  %s14_s11 = sshll.u32 %s182_s0, 4  ;;  %s153_s12 = smov [#allocation2]   ;;  %s15_s11 = int_to_ptr.hbm [resolvable:$true] %s14_s11 }
   0x3   :  { %s16_s13 = sshll.u32 %s153_s12, 4  ;;  %s28_s16 = sshll.u32 %s183_s1, 4  ;;  %s17_s13 = int_to_ptr.vmem [resolvable:$true] %s16_s13  ;;  %s29_s16 = int_to_ptr.hbm [resolvable:$true] %s28_s16 }
   0x4   :  { %s154_s17 = smov 128   ;;  %s155_s18 = smov 8  }
   0x5   :  { %22 = dma.hbm_to_vmem [thread:$0]  %s15_s11, 256, %s17_s13, [#allocation3], %s154_s17, %s154_s17, %s155_s18  }
   0x6   :  { %s156_s19 = smov [#allocation5]  }
   0x7   :  { %s30_s20 = sshll.u32 %s156_s19, 4  ;;  %s31_s20 = int_to_ptr.vmem [resolvable:$true] %s30_s20 }
   0x8   :  { %33 = dma.hbm_to_vmem [thread:$0]  %s29_s16, 128, %s31_s20, [#allocation6]  }
   0x9   :  { %147 = dma.done.wait [#allocation3], 256  }
   0xa   :  { %148 = vsyncadd [#allocation3], 4294967040 }
   0xb   :  { %149 = dma.done.wait [#allocation6], 128  }
   0xc   :  { %150 = vsyncadd [#allocation6], 4294967168  ;;  %s157_s0 = smov [#allocation7]   ;;  %s56_s24 = sshll.u32 %s184_s2, 4  ;;  %v42_v0 = vld [vmem:[#allocation2] sm:$0xff]  ;;  %v44_v1 = vld [vmem:[#allocation5] sm:$0xff]  ;;  %s57_s24 = int_to_ptr.hbm [resolvable:$true] %s56_s24 }
   0xd   :  { %s54_s21 = sshll.u32 %s157_s0, 4  ;;  %vm47_vm0 = vcmask 261120   ;;  %v43_v2 = vld [vmem:[#allocation2 + $0x8] sm:$0xff]  ;;  %v45_v3 = vadd.f32 %v44_v1, %v42_v0  ;;  %s55_s21 = int_to_ptr.vmem [resolvable:$true] %s54_s21 }
   0xe   :  { %v46_v4 = vadd.f32 %v44_v1, %v43_v2 }
   0xf   :  { %48 = vst.msk [vmem:[#allocation7] sm:$0xff] %vm47_vm0, %v45_v3 }
  0x10   :  { %49 = vst.msk [vmem:[#allocation7 + $0x8] sm:$0xff] %vm47_vm0, %v46_v4 }
  0x11   :  { %62 = dma.vmem_to_hbm [thread:$0]  %s55_s21, 256, %s57_s24, [#allocation4], %s154_s17, %s154_s17, %s155_s18  }
  0x12   :  { %151 = dma.done.wait [#allocation4], 256  }
  0x13   :  { %152 = vsyncadd [#allocation4], 4294967040 }
  0x14   :  { %67 = vsyncpa [#allocation3], 1 }
  0x15   :  { %68 = vsyncpa [#allocation6], 1 }
  0x16   :  { %69 = vsyncpa [#allocation4], 1 }

</bundles_post_ra>
